<compile_context>
chip_gen: v5e
topology: v5e:2x2
jax: 0.10.0
libtpu: 0.0.40
codegen_flags: <defaults>
</compile_context>

<pallas_src>
import jax
import jax.numpy as jnp
from jax.experimental import pallas as pl
from jax.experimental.pallas import tpu as pltpu

# Small, forward-consistent shapes.
B, S, D, FF, VOCAB = 2, 8, 32, 64, 100
BS = B * S
N_SPAN = 2                    # start / end logits
W = 128                       # lane-dense working width (one lane tile)
POS_BASE = VOCAB              # tiled positional rows live right after vocab
LN_EPS = 1e-12                # HF BERT-style eps
NEG_INF = -1e9
SHIFT = (S - 1).bit_length()  # log2(S) for block-id computation

# weight-slab row offsets; each block is a full (W, W) tile
R_EMB, R_WQ, R_WK, R_WV, R_WO, R_W1, R_W2, R_WQA = [i * W for i in range(8)]
SLAB_ROWS = 8 * W


def qa_kernel(ids_ref, wslab_ref, cvec_ref, out_ref):
    # ---- fused embedding + positional lookup (two-hot MXU gather) ----
    ids = ids_ref[...]                                        # (BS, 1) int32
    col = jax.lax.broadcasted_iota(jnp.int32, (BS, W), 1)
    row = jax.lax.broadcasted_iota(jnp.int32, (BS, 1), 0)
    hot = jnp.where((col == ids) | (col == row + POS_BASE), 1.0, 0.0)
    hot = hot.astype(jnp.bfloat16)
    x = jnp.dot(hot, wslab_ref[R_EMB:R_EMB + W, :],
                preferred_element_type=jnp.float32)           # (BS, W) = emb[id]+pos[s]

    # ---- Q/K/V/O projections (1/sqrt(D) pre-folded into Wq) ----
    xb = x.astype(jnp.bfloat16)
    q = jnp.dot(xb, wslab_ref[R_WQ:R_WQ + W, :], preferred_element_type=jnp.float32)
    k = jnp.dot(xb, wslab_ref[R_WK:R_WK + W, :], preferred_element_type=jnp.float32)
    v = jnp.dot(xb, wslab_ref[R_WV:R_WV + W, :], preferred_element_type=jnp.float32)

    # ---- single-head self-attention, 2-D with block-diagonal batch mask ----
    s = jnp.einsum('qd,kd->qk', q.astype(jnp.bfloat16), k.astype(jnp.bfloat16),
                   preferred_element_type=jnp.float32)        # (BS, BS)
    rq = jax.lax.broadcasted_iota(jnp.int32, (BS, BS), 0)
    rk = jax.lax.broadcasted_iota(jnp.int32, (BS, BS), 1)
    same_batch = jnp.right_shift(rq, SHIFT) == jnp.right_shift(rk, SHIFT)
    s = jnp.where(same_batch, s, NEG_INF)

    s = s - jnp.max(s, axis=-1, keepdims=True)
    p = jnp.exp(s)
    p = p * pl.reciprocal(jnp.sum(p, axis=-1, keepdims=True), approx=True)

    ctx = jnp.dot(p.astype(jnp.bfloat16), v.astype(jnp.bfloat16),
                  preferred_element_type=jnp.float32)         # (BS, W)
    attn = jnp.dot(ctx.astype(jnp.bfloat16), wslab_ref[R_WO:R_WO + W, :],
                   preferred_element_type=jnp.float32)        # (BS, W)

    # packed constants (lanes beyond the real width are zero -> re-zero pads)
    g1 = cvec_ref[0:1, :]
    be1 = cvec_ref[1:2, :]
    bf1 = cvec_ref[2:3, :]
    bf2 = cvec_ref[3:4, :]
    g2 = cvec_ref[4:5, :]
    be2 = cvec_ref[5:6, :]
    bqa = cvec_ref[6:7, :]

    inv_d = jnp.float32(1.0 / D)

    # ---- residual + LayerNorm 1 (one-pass variance, clamped) ----
    h = x + attn
    mu = jnp.sum(h, axis=-1, keepdims=True) * inv_d
    var = jnp.maximum(jnp.sum(h * h, axis=-1, keepdims=True) * inv_d - mu * mu, 0.0)
    h = (h - mu) * jax.lax.rsqrt(var + LN_EPS) * g1 + be1

    # ---- feed-forward (GELU) ----
    # TODO(synk): HF BERT uses exact (erf) GELU; tanh approximation kept here.
    f = jnp.dot(h.astype(jnp.bfloat16), wslab_ref[R_W1:R_W1 + W, :],
                preferred_element_type=jnp.float32) + bf1
    f = jax.nn.gelu(f)
    f = jnp.dot(f.astype(jnp.bfloat16), wslab_ref[R_W2:R_W2 + W, :],
                preferred_element_type=jnp.float32) + bf2

    # ---- residual + LayerNorm 2 ----
    h2 = h + f
    mu2 = jnp.sum(h2, axis=-1, keepdims=True) * inv_d
    var2 = jnp.maximum(jnp.sum(h2 * h2, axis=-1, keepdims=True) * inv_d - mu2 * mu2, 0.0)
    h2 = (h2 - mu2) * jax.lax.rsqrt(var2 + LN_EPS) * g2 + be2

    # ---- QA span head: lane-dense 128-wide full-width store ----
    out_ref[...] = jnp.dot(h2.astype(jnp.bfloat16), wslab_ref[R_WQA:R_WQA + W, :],
                           preferred_element_type=jnp.float32) + bqa


def init_params(key):
    ks = jax.random.split(key, 9)
    w = lambda k, shape: (0.02 * jax.random.normal(k, shape)).astype(jnp.float32)
    emb = w(ks[0], (VOCAB, D))
    pos = w(ks[1], (S, D))
    wq = w(ks[2], (D, D)) / jnp.sqrt(jnp.float32(D))   # fold attention scale
    wk = w(ks[3], (D, D))
    wv = w(ks[4], (D, D))
    wo = w(ks[5], (D, D))
    w1 = w(ks[6], (D, FF))
    w2 = w(ks[7], (FF, D))
    wqa = w(ks[8], (D, N_SPAN))

    def pad_block(m):
        return jnp.zeros((W, W), jnp.float32).at[:m.shape[0], :m.shape[1]].set(m)

    # gather table: vocab rows 0..99, batch-tiled positional rows 100..115
    embpos = jnp.zeros((W, W), jnp.float32)
    embpos = embpos.at[:VOCAB, :D].set(emb)
    embpos = embpos.at[POS_BASE:POS_BASE + BS, :D].set(jnp.tile(pos, (B, 1)))

    wslab = jnp.concatenate(
        [embpos] + [pad_block(m) for m in (wq, wk, wv, wo, w1, w2, wqa)],
        axis=0).astype(jnp.bfloat16)                     # (SLAB_ROWS, W)

    # constant slab rows: g1, be1, bf1, bf2, g2, be2, bqa, pad
    cvec = jnp.zeros((8, W), jnp.float32)
    cvec = cvec.at[0, :D].set(1.0)   # g1 = ones (zero in padded lanes)
    cvec = cvec.at[4, :D].set(1.0)   # g2 = ones
    return {"wslab": wslab, "cvec": cvec}


def qa_forward(token_ids, params):
    ids2d = token_ids.reshape(BS, 1).astype(jnp.int32)
    vmem = pl.BlockSpec(memory_space=pltpu.MemorySpace.VMEM)
    out = pl.pallas_call(
        qa_kernel,
        out_shape=jax.ShapeDtypeStruct((BS, W), jnp.float32),
        in_specs=[vmem, vmem, vmem],
        out_specs=vmem,
    )(ids2d, params["wslab"], params["cvec"])
    # wrapper-side (free) reshape + slice back to the 2 real span logits
    return out.reshape(B, S, W)[..., :N_SPAN]


if __name__ == "__main__":
    key = jax.random.PRNGKey(0)
    k_params, k_ids = jax.random.split(key)
    params = init_params(k_params)
    # "query_doc_input" after tokenization: integer token ids (B, S)
    token_ids = jax.random.randint(k_ids, (B, S), 0, VOCAB)

    logits = qa_forward(token_ids, params)
    logits = jax.block_until_ready(logits)

    assert logits.shape == (B, S, N_SPAN)
    assert bool(jnp.all(jnp.isfinite(logits)))
    print("KERNEL_OK")
</pallas_src>

<mosaic_0001>
module attributes {stable_mosaic.version = 11 : i64} {
  func.func @qa_kernel(%arg0: memref<16x1xi32, #tpu.memory_space<vmem>>, %arg1: memref<1024x128xbf16, #tpu.memory_space<vmem>>, %arg2: memref<8x128xf32, #tpu.memory_space<vmem>>, %arg3: memref<16x128xf32, #tpu.memory_space<vmem>>) attributes {dimension_semantics = [], scalar_prefetch = 0 : i64, scratch_operands = 0 : i64, tpu.core_type = #tpu.core_type<tc>} {
    %c0 = arith.constant 0 : index
    %c0_0 = arith.constant 0 : index
    %0 = vector.load %arg0[%c0, %c0_0] : memref<16x1xi32, #tpu.memory_space<vmem>>, vector<16x1xi32>
    %1 = tpu.iota {dimensions = array<i32: 1>} : vector<16x128xi32>
    %2 = tpu.iota {dimensions = array<i32: 0>} : vector<16x1xi32>
    %3 = vector.broadcast %0 : vector<16x1xi32> to vector<16x128xi32>
    %4 = arith.cmpi eq, %1, %3 : vector<16x128xi32>
    %c100_i32 = arith.constant 100 : i32
    %5 = vector.broadcast %c100_i32 : i32 to vector<16x1xi32>
    %6 = arith.addi %2, %5 : vector<16x1xi32>
    %7 = vector.broadcast %6 : vector<16x1xi32> to vector<16x128xi32>
    %8 = arith.cmpi eq, %1, %7 : vector<16x128xi32>
    %9 = arith.ori %4, %8 : vector<16x128xi1>
    %cst = arith.constant 1.000000e+00 : f32
    %cst_1 = arith.constant 0.000000e+00 : f32
    %10 = vector.broadcast %cst : f32 to vector<16x128xf32>
    %11 = vector.broadcast %cst_1 : f32 to vector<16x128xf32>
    %12 = arith.select %9, %10, %11 : vector<16x128xi1>, vector<16x128xf32>
    %13 = arith.truncf %12 : vector<16x128xf32> to vector<16x128xbf16>
    %c0_2 = arith.constant 0 : index
    %c0_3 = arith.constant 0 : index
    %14 = vector.load %arg1[%c0_2, %c0_3] : memref<1024x128xbf16, #tpu.memory_space<vmem>>, vector<128x128xbf16>
    %cst_4 = arith.constant dense<0.000000e+00> : vector<16x128xf32>
    %15 = tpu.matmul %13, %14, %cst_4 {dimension_numbers = #tpu.dot_dimension_numbers<[1], [0], [0], [1], [0, 0, 1, 1], [], []>} : vector<16x128xbf16>, vector<128x128xbf16>, vector<16x128xf32> -> vector<16x128xf32>
    %16 = arith.truncf %15 : vector<16x128xf32> to vector<16x128xbf16>
    %c128 = arith.constant 128 : index
    %c0_5 = arith.constant 0 : index
    %17 = vector.load %arg1[%c128, %c0_5] : memref<1024x128xbf16, #tpu.memory_space<vmem>>, vector<128x128xbf16>
    %cst_6 = arith.constant dense<0.000000e+00> : vector<16x128xf32>
    %18 = tpu.matmul %16, %17, %cst_6 {dimension_numbers = #tpu.dot_dimension_numbers<[1], [0], [0], [1], [0, 0, 1, 1], [], []>} : vector<16x128xbf16>, vector<128x128xbf16>, vector<16x128xf32> -> vector<16x128xf32>
    %c256 = arith.constant 256 : index
    %c0_7 = arith.constant 0 : index
    %19 = vector.load %arg1[%c256, %c0_7] : memref<1024x128xbf16, #tpu.memory_space<vmem>>, vector<128x128xbf16>
    %cst_8 = arith.constant dense<0.000000e+00> : vector<16x128xf32>
    %20 = tpu.matmul %16, %19, %cst_8 {dimension_numbers = #tpu.dot_dimension_numbers<[1], [0], [0], [1], [0, 0, 1, 1], [], []>} : vector<16x128xbf16>, vector<128x128xbf16>, vector<16x128xf32> -> vector<16x128xf32>
    %c384 = arith.constant 384 : index
    %c0_9 = arith.constant 0 : index
    %21 = vector.load %arg1[%c384, %c0_9] : memref<1024x128xbf16, #tpu.memory_space<vmem>>, vector<128x128xbf16>
    %cst_10 = arith.constant dense<0.000000e+00> : vector<16x128xf32>
    %22 = tpu.matmul %16, %21, %cst_10 {dimension_numbers = #tpu.dot_dimension_numbers<[1], [0], [0], [1], [0, 0, 1, 1], [], []>} : vector<16x128xbf16>, vector<128x128xbf16>, vector<16x128xf32> -> vector<16x128xf32>
    %23 = arith.truncf %18 : vector<16x128xf32> to vector<16x128xbf16>
    %24 = arith.truncf %20 : vector<16x128xf32> to vector<16x128xbf16>
    "tpu.trace_start"() <{level = 10 : i32, message = "qd,kd->qk"}> : () -> ()
    %cst_11 = arith.constant dense<0.000000e+00> : vector<16x16xf32>
    %25 = tpu.matmul %23, %24, %cst_11 {dimension_numbers = #tpu.dot_dimension_numbers<[1], [1], [0], [0], [0, 0, 1, 0], [], []>} : vector<16x128xbf16>, vector<16x128xbf16>, vector<16x16xf32> -> vector<16x16xf32>
    "tpu.trace_stop"() : () -> ()
    %26 = tpu.iota {dimensions = array<i32: 0>} : vector<16x16xi32>
    %27 = tpu.iota {dimensions = array<i32: 1>} : vector<16x16xi32>
    %c3_i32 = arith.constant 3 : i32
    %28 = vector.broadcast %c3_i32 : i32 to vector<16x16xi32>
    %29 = arith.shrsi %26, %28 : vector<16x16xi32>
    %c3_i32_12 = arith.constant 3 : i32
    %30 = vector.broadcast %c3_i32_12 : i32 to vector<16x16xi32>
    %31 = arith.shrsi %27, %30 : vector<16x16xi32>
    %32 = arith.cmpi eq, %29, %31 : vector<16x16xi32>
    %cst_13 = arith.constant -1.000000e+09 : f32
    %33 = vector.broadcast %cst_13 : f32 to vector<16x16xf32>
    %34 = arith.select %32, %25, %33 : vector<16x16xi1>, vector<16x16xf32>
    %cst_14 = arith.constant dense<0xFF800000> : vector<16xf32>
    %35 = vector.multi_reduction <maximumf>, %34, %cst_14 [1] : vector<16x16xf32> to vector<16xf32>
    %36 = vector.shape_cast %35 : vector<16xf32> to vector<16x1xf32>
    %37 = vector.broadcast %36 : vector<16x1xf32> to vector<16x16xf32>
    %38 = arith.subf %34, %37 : vector<16x16xf32>
    %39 = math.exp %38 : vector<16x16xf32>
    %cst_15 = arith.constant dense<0.000000e+00> : vector<16xf32>
    %40 = vector.multi_reduction <add>, %39, %cst_15 [1] : vector<16x16xf32> to vector<16xf32>
    %41 = vector.shape_cast %40 : vector<16xf32> to vector<16x1xf32>
    %42 = tpu.reciprocal %41 {approx = true} : vector<16x1xf32> -> vector<16x1xf32>
    %43 = vector.broadcast %42 : vector<16x1xf32> to vector<16x16xf32>
    %44 = arith.mulf %39, %43 : vector<16x16xf32>
    %45 = arith.truncf %44 : vector<16x16xf32> to vector<16x16xbf16>
    %46 = arith.truncf %22 : vector<16x128xf32> to vector<16x128xbf16>
    %cst_16 = arith.constant dense<0.000000e+00> : vector<16x128xf32>
    %47 = tpu.matmul %45, %46, %cst_16 {dimension_numbers = #tpu.dot_dimension_numbers<[1], [0], [0], [1], [0, 0, 1, 1], [], []>} : vector<16x16xbf16>, vector<16x128xbf16>, vector<16x128xf32> -> vector<16x128xf32>
    %48 = arith.truncf %47 : vector<16x128xf32> to vector<16x128xbf16>
    %c512 = arith.constant 512 : index
    %c0_17 = arith.constant 0 : index
    %49 = vector.load %arg1[%c512, %c0_17] : memref<1024x128xbf16, #tpu.memory_space<vmem>>, vector<128x128xbf16>
    %cst_18 = arith.constant dense<0.000000e+00> : vector<16x128xf32>
    %50 = tpu.matmul %48, %49, %cst_18 {dimension_numbers = #tpu.dot_dimension_numbers<[1], [0], [0], [1], [0, 0, 1, 1], [], []>} : vector<16x128xbf16>, vector<128x128xbf16>, vector<16x128xf32> -> vector<16x128xf32>
    %c0_19 = arith.constant 0 : index
    %c0_20 = arith.constant 0 : index
    %51 = vector.load %arg2[%c0_19, %c0_20] : memref<8x128xf32, #tpu.memory_space<vmem>>, vector<1x128xf32>
    %c1 = arith.constant 1 : index
    %c0_21 = arith.constant 0 : index
    %52 = vector.load %arg2[%c1, %c0_21] : memref<8x128xf32, #tpu.memory_space<vmem>>, vector<1x128xf32>
    %c2 = arith.constant 2 : index
    %c0_22 = arith.constant 0 : index
    %53 = vector.load %arg2[%c2, %c0_22] : memref<8x128xf32, #tpu.memory_space<vmem>>, vector<1x128xf32>
    %c3 = arith.constant 3 : index
    %c0_23 = arith.constant 0 : index
    %54 = vector.load %arg2[%c3, %c0_23] : memref<8x128xf32, #tpu.memory_space<vmem>>, vector<1x128xf32>
    %c4 = arith.constant 4 : index
    %c0_24 = arith.constant 0 : index
    %55 = vector.load %arg2[%c4, %c0_24] : memref<8x128xf32, #tpu.memory_space<vmem>>, vector<1x128xf32>
    %c5 = arith.constant 5 : index
    %c0_25 = arith.constant 0 : index
    %56 = vector.load %arg2[%c5, %c0_25] : memref<8x128xf32, #tpu.memory_space<vmem>>, vector<1x128xf32>
    %c6 = arith.constant 6 : index
    %c0_26 = arith.constant 0 : index
    %57 = vector.load %arg2[%c6, %c0_26] : memref<8x128xf32, #tpu.memory_space<vmem>>, vector<1x128xf32>
    %58 = arith.addf %15, %50 : vector<16x128xf32>
    %cst_27 = arith.constant dense<0.000000e+00> : vector<16xf32>
    %59 = vector.multi_reduction <add>, %58, %cst_27 [1] : vector<16x128xf32> to vector<16xf32>
    %60 = vector.shape_cast %59 : vector<16xf32> to vector<16x1xf32>
    %cst_28 = arith.constant 3.125000e-02 : f32
    %61 = vector.broadcast %cst_28 : f32 to vector<16x1xf32>
    %62 = arith.mulf %60, %61 : vector<16x1xf32>
    %63 = arith.mulf %58, %58 : vector<16x128xf32>
    %cst_29 = arith.constant dense<0.000000e+00> : vector<16xf32>
    %64 = vector.multi_reduction <add>, %63, %cst_29 [1] : vector<16x128xf32> to vector<16xf32>
    %65 = vector.shape_cast %64 : vector<16xf32> to vector<16x1xf32>
    %cst_30 = arith.constant 3.125000e-02 : f32
    %66 = vector.broadcast %cst_30 : f32 to vector<16x1xf32>
    %67 = arith.mulf %65, %66 : vector<16x1xf32>
    %68 = arith.mulf %62, %62 : vector<16x1xf32>
    %69 = arith.subf %67, %68 : vector<16x1xf32>
    %cst_31 = arith.constant 0.000000e+00 : f32
    %70 = vector.broadcast %cst_31 : f32 to vector<16x1xf32>
    %71 = arith.maximumf %69, %70 : vector<16x1xf32>
    %72 = vector.broadcast %62 : vector<16x1xf32> to vector<16x128xf32>
    %73 = arith.subf %58, %72 : vector<16x128xf32>
    %cst_32 = arith.constant 9.99999996E-13 : f32
    %74 = vector.broadcast %cst_32 : f32 to vector<16x1xf32>
    %75 = arith.addf %71, %74 : vector<16x1xf32>
    %76 = math.rsqrt %75 : vector<16x1xf32>
    %77 = vector.broadcast %76 : vector<16x1xf32> to vector<16x128xf32>
    %78 = arith.mulf %73, %77 : vector<16x128xf32>
    %79 = vector.broadcast %51 : vector<1x128xf32> to vector<16x128xf32>
    %80 = arith.mulf %78, %79 : vector<16x128xf32>
    %81 = vector.broadcast %52 : vector<1x128xf32> to vector<16x128xf32>
    %82 = arith.addf %80, %81 : vector<16x128xf32>
    %83 = arith.truncf %82 : vector<16x128xf32> to vector<16x128xbf16>
    %c640 = arith.constant 640 : index
    %c0_33 = arith.constant 0 : index
    %84 = vector.load %arg1[%c640, %c0_33] : memref<1024x128xbf16, #tpu.memory_space<vmem>>, vector<128x128xbf16>
    %cst_34 = arith.constant dense<0.000000e+00> : vector<16x128xf32>
    %85 = tpu.matmul %83, %84, %cst_34 {dimension_numbers = #tpu.dot_dimension_numbers<[1], [0], [0], [1], [0, 0, 1, 1], [], []>} : vector<16x128xbf16>, vector<128x128xbf16>, vector<16x128xf32> -> vector<16x128xf32>
    %86 = vector.broadcast %53 : vector<1x128xf32> to vector<16x128xf32>
    %87 = arith.addf %85, %86 : vector<16x128xf32>
    %88 = arith.mulf %87, %87 : vector<16x128xf32>
    %89 = arith.mulf %87, %88 : vector<16x128xf32>
    %cst_35 = arith.constant 4.471500e-02 : f32
    %90 = vector.broadcast %cst_35 : f32 to vector<16x128xf32>
    %91 = arith.mulf %90, %89 : vector<16x128xf32>
    %92 = arith.addf %87, %91 : vector<16x128xf32>
    %cst_36 = arith.constant 0.797884583 : f32
    %93 = vector.broadcast %cst_36 : f32 to vector<16x128xf32>
    %94 = arith.mulf %93, %92 : vector<16x128xf32>
    %95 = math.tanh %94 : vector<16x128xf32>
    %cst_37 = arith.constant 1.000000e+00 : f32
    %96 = vector.broadcast %cst_37 : f32 to vector<16x128xf32>
    %97 = arith.addf %96, %95 : vector<16x128xf32>
    %cst_38 = arith.constant 5.000000e-01 : f32
    %98 = vector.broadcast %cst_38 : f32 to vector<16x128xf32>
    %99 = arith.mulf %98, %97 : vector<16x128xf32>
    %100 = arith.mulf %87, %99 : vector<16x128xf32>
    %101 = arith.truncf %100 : vector<16x128xf32> to vector<16x128xbf16>
    %c768 = arith.constant 768 : index
    %c0_39 = arith.constant 0 : index
    %102 = vector.load %arg1[%c768, %c0_39] : memref<1024x128xbf16, #tpu.memory_space<vmem>>, vector<128x128xbf16>
    %cst_40 = arith.constant dense<0.000000e+00> : vector<16x128xf32>
    %103 = tpu.matmul %101, %102, %cst_40 {dimension_numbers = #tpu.dot_dimension_numbers<[1], [0], [0], [1], [0, 0, 1, 1], [], []>} : vector<16x128xbf16>, vector<128x128xbf16>, vector<16x128xf32> -> vector<16x128xf32>
    %104 = vector.broadcast %54 : vector<1x128xf32> to vector<16x128xf32>
    %105 = arith.addf %103, %104 : vector<16x128xf32>
    %106 = arith.addf %82, %105 : vector<16x128xf32>
    %cst_41 = arith.constant dense<0.000000e+00> : vector<16xf32>
    %107 = vector.multi_reduction <add>, %106, %cst_41 [1] : vector<16x128xf32> to vector<16xf32>
    %108 = vector.shape_cast %107 : vector<16xf32> to vector<16x1xf32>
    %cst_42 = arith.constant 3.125000e-02 : f32
    %109 = vector.broadcast %cst_42 : f32 to vector<16x1xf32>
    %110 = arith.mulf %108, %109 : vector<16x1xf32>
    %111 = arith.mulf %106, %106 : vector<16x128xf32>
    %cst_43 = arith.constant dense<0.000000e+00> : vector<16xf32>
    %112 = vector.multi_reduction <add>, %111, %cst_43 [1] : vector<16x128xf32> to vector<16xf32>
    %113 = vector.shape_cast %112 : vector<16xf32> to vector<16x1xf32>
    %cst_44 = arith.constant 3.125000e-02 : f32
    %114 = vector.broadcast %cst_44 : f32 to vector<16x1xf32>
    %115 = arith.mulf %113, %114 : vector<16x1xf32>
    %116 = arith.mulf %110, %110 : vector<16x1xf32>
    %117 = arith.subf %115, %116 : vector<16x1xf32>
    %cst_45 = arith.constant 0.000000e+00 : f32
    %118 = vector.broadcast %cst_45 : f32 to vector<16x1xf32>
    %119 = arith.maximumf %117, %118 : vector<16x1xf32>
    %120 = vector.broadcast %110 : vector<16x1xf32> to vector<16x128xf32>
    %121 = arith.subf %106, %120 : vector<16x128xf32>
    %cst_46 = arith.constant 9.99999996E-13 : f32
    %122 = vector.broadcast %cst_46 : f32 to vector<16x1xf32>
    %123 = arith.addf %119, %122 : vector<16x1xf32>
    %124 = math.rsqrt %123 : vector<16x1xf32>
    %125 = vector.broadcast %124 : vector<16x1xf32> to vector<16x128xf32>
    %126 = arith.mulf %121, %125 : vector<16x128xf32>
    %127 = vector.broadcast %55 : vector<1x128xf32> to vector<16x128xf32>
    %128 = arith.mulf %126, %127 : vector<16x128xf32>
    %129 = vector.broadcast %56 : vector<1x128xf32> to vector<16x128xf32>
    %130 = arith.addf %128, %129 : vector<16x128xf32>
    %131 = arith.truncf %130 : vector<16x128xf32> to vector<16x128xbf16>
    %c896 = arith.constant 896 : index
    %c0_47 = arith.constant 0 : index
    %132 = vector.load %arg1[%c896, %c0_47] : memref<1024x128xbf16, #tpu.memory_space<vmem>>, vector<128x128xbf16>
    %cst_48 = arith.constant dense<0.000000e+00> : vector<16x128xf32>
    %133 = tpu.matmul %131, %132, %cst_48 {dimension_numbers = #tpu.dot_dimension_numbers<[1], [0], [0], [1], [0, 0, 1, 1], [], []>} : vector<16x128xbf16>, vector<128x128xbf16>, vector<16x128xf32> -> vector<16x128xf32>
    %134 = vector.broadcast %57 : vector<1x128xf32> to vector<16x128xf32>
    %135 = arith.addf %133, %134 : vector<16x128xf32>
    %c0_49 = arith.constant 0 : index
    %c0_50 = arith.constant 0 : index
    %136 = vector.load %arg3[%c0_49, %c0_50] : memref<16x128xf32, #tpu.memory_space<vmem>>, vector<16x128xf32>
    tpu.vector_store %arg3[%c0_49, %c0_50], %135 {strides = array<i32>} : memref<16x128xf32, #tpu.memory_space<vmem>>, vector<16x128xf32>,
    return
  }
}

</mosaic_0001>

<bundles_post_ra>
// kernel: tpu_custom_call.1
= control target key start
LH: loop header
LB: loop body
LE: loop exit
PB: predicated region body
PF: predicated region fallthrough
CT: control target
= control target key end

     0   :  { %8 = vsyncpa [#allocation3], 0  ;;  %s1404_s0 = inlined_call_operand.vmem [shape: s32[16,1], index: 0, kind: input, shape index: {}]   ;;  %s1405_s1 = inlined_call_operand.hbm [shape: bf16[1024,128], index: 1, kind: input, shape index: {}]   ;;  %s1406_s2 = inlined_call_operand.vmem [shape: f32[8,128], index: 2, kind: input, shape index: {}]   ;;  %s1407_s3 = inlined_call_operand.hbm [shape: f32[16,128], index: 3, kind: output, shape index: {}]  }
   0x1   :  { %9 = vsyncpa [#allocation4], 0  ;;  %s16_s14 = sshll.u32 %s1405_s1, 4  ;;  %s1318_s15 = smov [#allocation2]   ;;  %s17_s14 = int_to_ptr.hbm [resolvable:$true] %s16_s14 }
   0x2   :  { %s18_s16 = sshll.u32 %s1318_s15, 4  ;;  %s1319_s17 = smov 64   ;;  %s19_s16 = int_to_ptr.vmem [resolvable:$true] %s18_s16 }
   0x3   :  { %s1320_s18 = smov 4  }
   0x4   :  { %24 = dma.hbm_to_vmem [thread:$0]  %s17_s14, 8192, %s19_s16, [#allocation3], %s1319_s17, %s1319_s17, %s1320_s18  }
   0x5   :  { %1314 = dma.done.wait [#allocation3], 8192  }
   0x6   :  { %1315 = vsyncadd [#allocation3], 4294959104  ;;  %v1321_v0 = vmov 0   ;;  %v32_v1 = vld [vmem:[%s1404_s0] sm:$0xff]  ;;  %v1173_v2 = vld [vmem:[#allocation2 + $0x38] sm:$0xff]  ;;  %v34_v23 = vlaneseq  ;;  %vm392_vm8 = vcmask 130048  }
   0x7   :  { %1238 = vset.pattern.permute.xlu0 %v1321_v0  ;;  %120 = vmatpush.bf16.msra.mxu0 %v1173_v2  ;;  %v1172_v3 = vld [vmem:[#allocation2 + $0x30] sm:$0xff]  ;;  %v33_v4 = vld [vmem:[%s1404_s0 + $0x8] sm:$0xff]  ;;  %v1170_v6 = vld [vmem:[#allocation2 + $0x20] sm:$0xff]  ;;  %v1322_v34 = vmov 1.0|1.0   ;;  %s1323_s8 = smov [#allocation5]  }
   0x8   :  { %40 = vperm.xlu0 %1238, %v32_v1   ;;  %v1171_v5 = vld [vmem:[#allocation2 + $0x28] sm:$0xff]  ;;  %v1169_v7 = vld [vmem:[#allocation2 + $0x18] sm:$0xff]  ;;  %v1168_v8 = vld [vmem:[#allocation2 + $0x10] sm:$0xff]  ;;  %v37_v27 = vshrl.u32 %v34_v23, 7  ;;  %v35_v30 = vand.u32 127, %v34_v23  ;;  %s892_s9 = sshll.u32 %s1323_s8, 4  ;;  %s893_s9 = int_to_ptr.vmem [resolvable:$true] %s892_s9 }
   0x9   :  { %v1167_v9 = vld [vmem:[#allocation2 + $0x8] sm:$0xff]  ;;  %v1166_v10 = vld [vmem:[#allocation2] sm:$0xff]  ;;  %v1181_v11 = vld [vmem:[#allocation2 + $0x78] sm:$0xff]  ;;  %s894_s12 = sshll.u32 %s1407_s3, 4  ;;  %s1324_s13 = smov 128   ;;  %s895_s12 = int_to_ptr.hbm [resolvable:$true] %s894_s12 }
   0xa   :  { %v1189_v12 = vld [vmem:[#allocation2 + $0xb8] sm:$0xff]  ;;  %199 = vmatpush.bf16.msra.mxu1 %v1181_v11  ;;  %v1180_v14 = vld [vmem:[#allocation2 + $0x70] sm:$0xff]  ;;  %v1179_v17 = vld [vmem:[#allocation2 + $0x68] sm:$0xff]  ;;  %v38_v28 = vadd.s32 8, %v37_v27  ;;  %v47_v31 = vadd.s32 100, %v37_v27  ;;  %v385_v56 = vshra.s32 %v37_v27, 3 }
   0xb   :  { %121 = vmatpush.bf16.msra.mxu0 %v1172_v3  ;;  %v1197_v13 = vld [vmem:[#allocation2 + $0xf8] sm:$0xff]  ;;  %277 = vmatpush.bf16.msra.mxu2 %v1189_v12  ;;  %v1188_v15 = vld [vmem:[#allocation2 + $0xb0] sm:$0xff]  ;;  %v1187_v18 = vld [vmem:[#allocation2 + $0xa8] sm:$0xff]  ;;  %v387_v57 = vshra.s32 %v35_v30, 3  ;;  %s1325_s14 = smov 8  }
   0xc   :  { %355 = vmatpush.bf16.msra.mxu3 %v1197_v13  ;;  %v1196_v16 = vld [vmem:[#allocation2 + $0xf0] sm:$0xff]  ;;  %v1195_v19 = vld [vmem:[#allocation2 + $0xe8] sm:$0xff]  ;;  %v1178_v20 = vld [vmem:[#allocation2 + $0x60] sm:$0xff]  ;;  %v48_v32 = vadd.s32 100, %v38_v28  ;;  %vm49_vm0 = vcmp.eq.s32.totalorder %v35_v30, %v47_v31  ;;  %v386_v61 = vshra.s32 %v38_v28, 3 }
   0xd   :  { %v1186_v21 = vld [vmem:[#allocation2 + $0xa0] sm:$0xff]  ;;  %v1177_v24 = vld [vmem:[#allocation2 + $0x58] sm:$0xff]  ;;  %v1176_v35 = vld [vmem:[#allocation2 + $0x50] sm:$0xff]  ;;  %vm388_vm7 = vcmp.eq.s32.totalorder %v385_v56, %v387_v57 }
   0xe   :  { %200 = vmatpush.bf16.msra.mxu1 %v1180_v14  ;;  %v1194_v22 = vld [vmem:[#allocation2 + $0xe0] sm:$0xff]  ;;  %v1185_v25 = vld [vmem:[#allocation2 + $0x98] sm:$0xff]  ;;  %vm50_vm2 = vcmp.eq.s32.totalorder %v35_v30, %v48_v32  ;;  %v1184_v36 = vld [vmem:[#allocation2 + $0x90] sm:$0xff]  ;;  %vm389_vm9 = vcmp.eq.s32.totalorder %v386_v61, %v387_v57 }
   0xf   :  { %122 = vmatpush.bf16.msra.mxu0 %v1171_v5  ;;  %278 = vmatpush.bf16.msra.mxu2 %v1188_v15  ;;  %v1193_v26 = vld [vmem:[#allocation2 + $0xd8] sm:$0xff]  ;;  %v1192_v37 = vld [vmem:[#allocation2 + $0xd0] sm:$0xff]  ;;  %v1175_v38 = vld [vmem:[#allocation2 + $0x48] sm:$0xff] }
  0x10   :  { %43 = vperm.xlu0 %1238, %v33_v4   ;;  %356 = vmatpush.bf16.msra.mxu3 %v1196_v16  ;;  %v1183_v39 = vld [vmem:[#allocation2 + $0x88] sm:$0xff]  ;;  %v1174_v41 = vld [vmem:[#allocation2 + $0x40] sm:$0xff]  ;;  %v1205_v11 = vld [vmem:[#allocation2 + $0x138] sm:$0xff] }
  0x11   :  { %v1191_v40 = vld [vmem:[#allocation2 + $0xc8] sm:$0xff]  ;;  %v1182_v42 = vld [vmem:[#allocation2 + $0x80] sm:$0xff]  ;;  %v1204_v12 = vld [vmem:[#allocation2 + $0x130] sm:$0xff] }
  0x12   :  { %201 = vmatpush.bf16.msra.mxu1 %v1179_v17  ;;  %v1190_v43 = vld [vmem:[#allocation2 + $0xc0] sm:$0xff]  ;;  %v1203_v13 = vld [vmem:[#allocation2 + $0x128] sm:$0xff]  ;;  %v1201_v16 = vld [vmem:[#allocation2 + $0x118] sm:$0xff] }
  0x13   :  { %123 = vmatpush.bf16.msra.mxu0 %v1170_v6  ;;  %279 = vmatpush.bf16.msra.mxu2 %v1187_v18  ;;  %v1202_v14 = vld [vmem:[#allocation2 + $0x120] sm:$0xff]  ;;  %v1200_v23 = vld [vmem:[#allocation2 + $0x110] sm:$0xff] }
  0x14   :  { %357 = vmatpush.bf16.msra.mxu3 %v1195_v19 }
  0x16   :  { %202 = vmatpush.bf16.msra.mxu1 %v1178_v20 }
  0x17   :  { %124 = vmatpush.bf16.msra.mxu0 %v1169_v7  ;;  %280 = vmatpush.bf16.msra.mxu2 %v1186_v21 }
  0x18   :  { %358 = vmatpush.bf16.msra.mxu3 %v1194_v22 }
  0x1a   :  { %203 = vmatpush.bf16.msra.mxu1 %v1177_v24  ;;  %v1199_v24 = vld [vmem:[#allocation2 + $0x108] sm:$0xff] }
  0x1b   :  { %125 = vmatpush.bf16.msra.mxu0 %v1168_v8  ;;  %281 = vmatpush.bf16.msra.mxu2 %v1185_v25  ;;  %v1198_v25 = vld [vmem:[#allocation2 + $0x100] sm:$0xff] }
  0x1c   :  { %359 = vmatpush.bf16.msra.mxu3 %v1193_v26 }
  0x1e   :  { %204 = vmatpush.bf16.msra.mxu1 %v1176_v35  ;;  %v1213_v35 = vld [vmem:[#allocation2 + $0x178] sm:$0xff] }
  0x1f   :  { %126 = vmatpush.bf16.msra.mxu0 %v1167_v9  ;;  %282 = vmatpush.bf16.msra.mxu2 %v1184_v36  ;;  %v1212_v36 = vld [vmem:[#allocation2 + $0x170] sm:$0xff] }
  0x20   :  { %360 = vmatpush.bf16.msra.mxu3 %v1192_v37  ;;  %v1211_v37 = vld [vmem:[#allocation2 + $0x168] sm:$0xff] }
  0x22   :  { %205 = vmatpush.bf16.msra.mxu1 %v1175_v38  ;;  %v1210_v38 = vld [vmem:[#allocation2 + $0x160] sm:$0xff] }
  0x23   :  { %127 = vmatpush.bf16.msra.mxu0 %v1166_v10  ;;  %283 = vmatpush.bf16.msra.mxu2 %v1183_v39 }
  0x24   :  { %361 = vmatpush.bf16.msra.mxu3 %v1191_v40 }
  0x26   :  { %206 = vmatpush.bf16.msra.mxu1 %v1174_v41 }
  0x27   :  { %284 = vmatpush.bf16.msra.mxu2 %v1182_v42 }
  0x28   :  { %362 = vmatpush.bf16.msra.mxu3 %v1190_v43 }
  0x2b   :  { %499 = vmatpush.bf16.msrb.mxu2 %v1205_v11 }
  0x2c   :  { %640 = vmatpush.bf16.msrb.mxu3 %v1213_v35 }
  0x2f   :  { %500 = vmatpush.bf16.msrb.mxu2 %v1204_v12 }
  0x30   :  { %641 = vmatpush.bf16.msrb.mxu3 %v1212_v36 }
  0x33   :  { %501 = vmatpush.bf16.msrb.mxu2 %v1203_v13 }
  0x34   :  { %642 = vmatpush.bf16.msrb.mxu3 %v1211_v37 }
  0x37   :  { %502 = vmatpush.bf16.msrb.mxu2 %v1202_v14 }
  0x38   :  { %643 = vmatpush.bf16.msrb.mxu3 %v1210_v38 }
  0x3b   :  { %503 = vmatpush.bf16.msrb.mxu2 %v1201_v16 }
  0x3f   :  { %504 = vmatpush.bf16.msrb.mxu2 %v1200_v23  ;;  %v1218_v23 = vld [vmem:[#allocation2 + $0x1a0] sm:$0xff] }
  0x43   :  { %505 = vmatpush.bf16.msrb.mxu2 %v1199_v24  ;;  %v1217_v24 = vld [vmem:[#allocation2 + $0x198] sm:$0xff] }
  0x47   :  { %506 = vmatpush.bf16.msrb.mxu2 %v1198_v25  ;;  %v1216_v25 = vld [vmem:[#allocation2 + $0x190] sm:$0xff] }
  0x7a   :  { %v41_v29 = vpop.permute.xlu0 %40 }
  0x7b   :  { %vm45_vm1 = vcmp.eq.s32.totalorder %v35_v30, %v41_v29 }
  0x7c   :  { %vm51_vm3 = vmor %vm45_vm1, %vm49_vm0 }
  0x82   :  { %v44_v33 = vpop.permute.xlu0 %43 }
  0x83   :  { %vm46_vm4 = vcmp.eq.s32.totalorder %v35_v30, %v44_v33 }
  0x84   :  { %vm52_vm5 = vmor %vm46_vm4, %vm50_vm2 }
  0x85   :  { %vm939_vm6 = vmpackc.low %vm52_vm5, %vm51_vm3 }
  0x86   :  { %940 = vmatmul.msk.bf16.vlgmr.msra.gmra.mxu0 %vm939_vm6, %v1322_v34 }
 0x103   :  { %v1355_v44 = vpop.f32.mrf.mxu0 }
 0x10b   :  { %v1357_v45 = vpop.f32.mrf.mxu0 }
 0x10c   :  { %v134_v46 = vpack.c.bf16 %v1357_v45, %v1355_v44 }
 0x10e   :  { %207 = vmatmul.bf16.vlgmr.msra.gmra.mxu1 %v134_v46  ;;  %285 = vmatmul.bf16.vlgmr.msra.gmra.mxu2 %v134_v46 }
 0x10f   :  { %363 = vmatmul.bf16.vlgmr.msra.gmra.mxu3 %v134_v46 }
 0x18b   :  { %v208_v49 = vpop.f32.mrf.mxu1 }
 0x191   :  { %v286_v47 = vpop.f32.mrf.mxu2 }
 0x192   :  { %v364_v48 = vpop.f32.mrf.mxu3 }
 0x193   :  { %v210_v54 = vpop.f32.mrf.mxu1 }
 0x194   :  { %v369_v55 = vpack.c.bf16 %v210_v54, %v208_v49 }
 0x199   :  { %v288_v50 = vpop.f32.mrf.mxu2 }
 0x19a   :  { %v370_v51 = vpack.c.bf16 %v288_v50, %v286_v47  ;;  %v366_v52 = vpop.f32.mrf.mxu3  ;;  %v1208_v47 = vld [vmem:[#allocation2 + $0x150] sm:$0xff]  ;;  %v1207_v50 = vld [vmem:[#allocation2 + $0x148] sm:$0xff] }
 0x19b   :  { %v416_v53 = vpack.c.bf16 %v366_v52, %v364_v48  ;;  %v1206_v52 = vld [vmem:[#allocation2 + $0x140] sm:$0xff] }
 0x19c   :  { %378 = vmatpush.bf16.xpose.msrb.mxu0 %v370_v51 }
 0x19d   :  { %427 = vmatpush.bf16.msrb.mxu1 %v416_v53 }
 0x1a3   :  { %379 = vmatmul.bf16.vlgmr.msrb.gmra.mxu0 %v369_v55 }
 0x220   :  { %v380_v58 = vpop.f32.mrf.mxu0 }
 0x221   :  { %v390_v59 = vsel %vm388_vm7, %v380_v58, -1e+09 }
 0x222   :  { %v393_v60 = vsel %vm392_vm8, %v390_v59, -inf }
 0x223   :  { %394 = vmax.xlane.f32.xlu1 %v393_v60 }
 0x228   :  { %v382_v62 = vpop.f32.mrf.mxu0 }
 0x229   :  { %v391_v63 = vsel %vm389_vm9, %v382_v62, -1e+09 }
 0x22a   :  { %v396_v0 = vsel %vm392_vm8, %v391_v63, -inf }
 0x22b   :  { %397 = vmax.xlane.f32.xlu1 %v396_v0 }
 0x296   :  { %v395_v1 = vpop.xlane.xlu1 %394 }
 0x297   :  { %v399_v2 = vsub.f32 %v390_v59, %v395_v1 }
 0x299   :  { %v401_v3 = vmul.f32 1.442695, %v399_v2 }
 0x29b   :  { %1246 = vpow2.f32 %v401_v3 }
 0x29e   :  { %v398_v4 = vpop.xlane.xlu1 %397 }
 0x29f   :  { %v400_v5 = vsub.f32 %v391_v63, %v398_v4 }
 0x2a1   :  { %v1247_v6 = vpop.eup %1246  ;;  %v403_v7 = vmul.f32 1.442695, %v400_v5 }
 0x2a2   :  { %v405_v8 = vsel %vm392_vm8, %v1247_v6, 0.0 }
 0x2a3   :  { %1248 = vpow2.f32 %v403_v7  ;;  %406 = vadd.xlane.f32.xlu2 %v405_v8 }
 0x2a9   :  { %v1249_v9 = vpop.eup %1248 }
 0x2aa   :  { %v408_v10 = vsel %vm392_vm8, %v1249_v9, 0.0 }
 0x2ab   :  { %409 = vadd.xlane.f32.xlu2 %v408_v10 }
 0x316   :  { %v407_v15 = vpop.xlane.xlu2 %406 }
 0x317   :  { %1250 = vrcp.f32 %v407_v15  ;;  %v1240_v15 = vld [vmem:[%s1406_s2 + $0x1] ss:$0 sm:$0xff] }
 0x31d   :  { %v1251_v18 = vpop.eup %1250 }
 0x31e   :  { %v410_v17 = vpop.xlane.xlu2 %409  ;;  %v413_v20 = vmul.f32 %v1251_v18, %v1247_v6 }
 0x31f   :  { %1252 = vrcp.f32 %v410_v17 }
 0x325   :  { %v1253_v19 = vpop.eup %1252 }
 0x326   :  { %v414_v21 = vmul.f32 %v1253_v19, %v1249_v9  ;;  %v1239_v9 = vld [vmem:[%s1406_s2] ss:$0 sm:$0xff] }
 0x328   :  { %v415_v22 = vpack.c.bf16 %v414_v21, %v413_v20  ;;  %v1221_v20 = vld [vmem:[#allocation2 + $0x1b8] sm:$0xff]  ;;  %v1220_v21 = vld [vmem:[#allocation2 + $0x1b0] sm:$0xff] }
 0x329   :  { %738 = vmatpush.bf16.msra.mxu0 %v1221_v20 }
 0x32a   :  { %1037 = vmatmul.msk.bf16.vlgmr.msrb.gmra.mxu1 %vm392_vm8, %v415_v22  ;;  %v1219_v22 = vld [vmem:[#allocation2 + $0x1a8] sm:$0xff] }
 0x32d   :  { %739 = vmatpush.bf16.msra.mxu0 %v1220_v21 }
 0x331   :  { %740 = vmatpush.bf16.msra.mxu0 %v1219_v22 }
 0x335   :  { %741 = vmatpush.bf16.msra.mxu0 %v1218_v23 }
 0x339   :  { %742 = vmatpush.bf16.msra.mxu0 %v1217_v24 }
 0x33d   :  { %743 = vmatpush.bf16.msra.mxu0 %v1216_v25 }
 0x3a7   :  { %v429_v26 = vpop.f32.mrf.mxu1 }
 0x3af   :  { %v431_v27 = vpop.f32.mrf.mxu1 }
 0x3b0   :  { %v434_v28 = vpack.c.bf16 %v431_v27, %v429_v26  ;;  %v1215_v26 = vld [vmem:[#allocation2 + $0x188] sm:$0xff]  ;;  %v1241_v27 = vld [vmem:[%s1406_s2 + $0x2] ss:$0 sm:$0xff] }
 0x3b1   :  { %744 = vmatpush.bf16.msra.mxu0 %v1215_v26 }
 0x3b2   :  { %507 = vmatmul.bf16.vlgmr.msrb.gmra.mxu2 %v434_v28 }
 0x435   :  { %v508_v29 = vpop.f32.mrf.mxu2 }
 0x436   :  { %v520_v30 = vadd.f32 %v508_v29, %v1355_v44  ;;  %v1209_v44 = vld [vmem:[#allocation2 + $0x158] sm:$0xff]  ;;  %v1214_v29 = vld [vmem:[#allocation2 + $0x180] sm:$0xff] }
 0x437   :  { %644 = vmatpush.bf16.msrb.mxu3 %v1209_v44  ;;  %745 = vmatpush.bf16.msra.mxu0 %v1214_v29 }
 0x438   :  { %522 = vadd.xlane.f32.xlu0 %v520_v30  ;;  %v528_v31 = vmul.f32 %v520_v30, %v520_v30 }
 0x43a   :  { %530 = vadd.xlane.f32.xlu2 %v528_v31 }
 0x43b   :  { %645 = vmatpush.bf16.msrb.mxu3 %v1208_v47 }
 0x43d   :  { %v510_v32 = vpop.f32.mrf.mxu2 }
 0x43e   :  { %v1368_v33 = vadd.f32 %v510_v32, %v1357_v45 }
 0x43f   :  { %646 = vmatpush.bf16.msrb.mxu3 %v1207_v50 }
 0x440   :  { %524 = vadd.xlane.f32.xlu1 %v1368_v33  ;;  %v529_v34 = vmul.f32 %v1368_v33, %v1368_v33 }
 0x443   :  { %647 = vmatpush.bf16.msrb.mxu3 %v1206_v52  ;;  %v1242_v52 = vld [vmem:[%s1406_s2 + $0x3] ss:$0 sm:$0xff] }
 0x448   :  { %532 = vadd.xlane.f32.xlu1 %v529_v34 }
 0x4ab   :  { %v523_v39 = vpop.xlane.xlu0 %522 }
 0x4ac   :  { %v526_v40 = vmul.f32 0.03125, %v523_v39 }
 0x4ad   :  { %v531_v41 = vpop.xlane.xlu2 %530 }
 0x4ae   :  { %v536_v42 = vmul.f32 %v526_v40, %v526_v40  ;;  %v534_v43 = vmul.f32 0.03125, %v531_v41  ;;  %v542_v6 = vsub.f32 %v520_v30, %v526_v40 }
 0x4b0   :  { %v538_v45 = vsub.f32 %v534_v43, %v536_v42 }
 0x4b2   :  { %v540_v46 = vmax.f32 %v538_v45, 0.0 }
 0x4b3   :  { %v525_v48 = vpop.xlane.xlu1 %524 }
 0x4b4   :  { %v544_v49 = vadd.f32 1e-12, %v540_v46  ;;  %v527_v51 = vmul.f32 0.03125, %v525_v48 }
 0x4b6   :  { %1254 = vrsqrt.f32 %v544_v49  ;;  %v537_v55 = vmul.f32 %v527_v51, %v527_v51  ;;  %vm552_vm11 = vweird.f32 %v544_v49  ;;  %v543_v11 = vsub.f32 %v1368_v33, %v527_v51 }
 0x4bb   :  { %v533_v53 = vpop.xlane.xlu1 %532 }
 0x4bc   :  { %v1255_v54 = vpop.eup %1254  ;;  %v535_v56 = vmul.f32 0.03125, %v533_v53 }
 0x4bd   :  { %v547_v57 = vmul.f32 %v1255_v54, %v544_v49  ;;  %vm553_vm10 = vweird.f32 %v1255_v54 }
 0x4be   :  { %v539_v58 = vsub.f32 %v535_v56, %v537_v55  ;;  %vm554_vm12 = vmor %vm552_vm11, %vm553_vm10 }
 0x4bf   :  { %v548_v59 = vmul.f32 %v1255_v54, %v547_v57 }
 0x4c0   :  { %v541_v60 = vmax.f32 %v539_v58, 0.0 }
 0x4c1   :  { %v549_v62 = vmul.f32 0.5, %v548_v59 }
 0x4c2   :  { %v545_v61 = vadd.f32 1e-12, %v541_v60 }
 0x4c3   :  { %v550_v63 = vsub.f32 1.5, %v549_v62  ;;  %v1228_v62 = vld [vmem:[#allocation2 + $0x1f0] sm:$0xff] }
 0x4c4   :  { %1256 = vrsqrt.f32 %v545_v61  ;;  %vm562_vm14 = vweird.f32 %v545_v61 }
 0x4c5   :  { %v551_v1 = vmul.f32 %v1255_v54, %v550_v63  ;;  %v1227_v63 = vld [vmem:[#allocation2 + $0x1e8] sm:$0xff] }
 0x4c7   :  { %v555_v5 = vsel %vm554_vm12, %v1255_v54, %v551_v1 }
 0x4c8   :  { %v566_v8 = vmul.f32 %v555_v5, %v542_v6 }
 0x4ca   :  { %v1257_v0 = vpop.eup %1256  ;;  %v569_v14 = vmul.f32 %v1239_v9, %v566_v8 }
 0x4cb   :  { %v557_v2 = vmul.f32 %v1257_v0, %v545_v61  ;;  %vm563_vm13 = vweird.f32 %v1257_v0  ;;  %v1229_v61 = vld [vmem:[#allocation2 + $0x1f8] sm:$0xff] }
 0x4cc   :  { %vm564_vm15 = vmor %vm562_vm14, %vm563_vm13  ;;  %v572_v17 = vadd.f32 %v1240_v15, %v569_v14  ;;  %872 = vmatpush.bf16.msra.mxu1 %v1229_v61 }
 0x4cd   :  { %v558_v3 = vmul.f32 %v1257_v0, %v557_v2  ;;  %v1225_v2 = vld [vmem:[#allocation2 + $0x1d8] sm:$0xff] }
 0x4cf   :  { %v559_v4 = vmul.f32 0.5, %v558_v3 }
 0x4d0   :  { %873 = vmatpush.bf16.msra.mxu1 %v1228_v62 }
 0x4d1   :  { %v560_v7 = vsub.f32 1.5, %v559_v4  ;;  %v1224_v4 = vld [vmem:[#allocation2 + $0x1d0] sm:$0xff] }
 0x4d3   :  { %v561_v10 = vmul.f32 %v1257_v0, %v560_v7 }
 0x4d4   :  { %874 = vmatpush.bf16.msra.mxu1 %v1227_v63 }
 0x4d5   :  { %v565_v12 = vsel %vm564_vm15, %v1257_v0, %v561_v10  ;;  %v1226_v0 = vld [vmem:[#allocation2 + $0x1e0] sm:$0xff]  ;;  %v1223_v10 = vld [vmem:[#allocation2 + $0x1c8] sm:$0xff] }
 0x4d6   :  { %v567_v13 = vmul.f32 %v565_v12, %v543_v11 }
 0x4d8   :  { %v570_v16 = vmul.f32 %v1239_v9, %v567_v13  ;;  %875 = vmatpush.bf16.msra.mxu1 %v1226_v0  ;;  %v1222_v13 = vld [vmem:[#allocation2 + $0x1c0] sm:$0xff] }
 0x4da   :  { %v573_v18 = vadd.f32 %v1240_v15, %v570_v16 }
 0x4dc   :  { %v574_v19 = vpack.c.bf16 %v573_v18, %v572_v17  ;;  %876 = vmatpush.bf16.msra.mxu1 %v1225_v2 }
 0x4de   :  { %648 = vmatmul.bf16.vlgmr.msrb.gmra.mxu3 %v574_v19 }
 0x4e0   :  { %877 = vmatpush.bf16.msra.mxu1 %v1224_v4 }
 0x4e4   :  { %878 = vmatpush.bf16.msra.mxu1 %v1223_v10 }
 0x4e8   :  { %879 = vmatpush.bf16.msra.mxu1 %v1222_v13 }
 0x561   :  { %v649_v28 = vpop.f32.mrf.mxu3 }
 0x562   :  { %v650_v30 = vadd.f32 %v1241_v27, %v649_v28 }
 0x564   :  { %v654_v31 = vmul.f32 %v650_v30, %v650_v30 }
 0x566   :  { %v656_v32 = vmul.f32 %v654_v31, %v650_v30 }
 0x568   :  { %v658_v33 = vmul.f32 0.044715, %v656_v32 }
 0x569   :  { %v651_v34 = vpop.f32.mrf.mxu3 }
 0x56a   :  { %v660_v35 = vadd.f32 %v658_v33, %v650_v30  ;;  %v652_v36 = vadd.f32 %v1241_v27, %v651_v34 }
 0x56c   :  { %v662_v37 = vmul.f32 0.7978846, %v660_v35  ;;  %v655_v38 = vmul.f32 %v652_v36, %v652_v36  ;;  %v1243_v35 = vld [vmem:[%s1406_s2 + $0x4] ss:$0 sm:$0xff] }
 0x56e   :  { %v657_v39 = vmul.f32 %v655_v38, %v652_v36  ;;  %1258 = vtanh.f32 %v662_v37 }
 0x570   :  { %v659_v40 = vmul.f32 0.044715, %v657_v39 }
 0x572   :  { %v661_v41 = vadd.f32 %v659_v40, %v652_v36 }
 0x574   :  { %v663_v42 = vmul.f32 0.7978846, %v661_v41  ;;  %v1259_v43 = vpop.eup %1258  ;;  %v1244_v41 = vld [vmem:[%s1406_s2 + $0x5] ss:$0 sm:$0xff] }
 0x575   :  { %v666_v44 = vadd.f32 1.0, %v1259_v43 }
 0x576   :  { %1260 = vtanh.f32 %v663_v42 }
 0x577   :  { %v668_v46 = vmul.f32 0.5, %v666_v44 }
 0x579   :  { %v670_v49 = vmul.f32 %v668_v46, %v650_v30  ;;  %v1245_v46 = vld [vmem:[%s1406_s2 + $0x6] ss:$0 sm:$0xff] }
 0x57c   :  { %v1261_v45 = vpop.eup %1260 }
 0x57d   :  { %v667_v47 = vadd.f32 1.0, %v1261_v45 }
 0x57f   :  { %v669_v48 = vmul.f32 0.5, %v667_v47 }
 0x581   :  { %v671_v50 = vmul.f32 %v669_v48, %v652_v36 }
 0x583   :  { %v672_v51 = vpack.c.bf16 %v671_v50, %v670_v49 }
 0x585   :  { %746 = vmatmul.bf16.vlgmr.msra.gmra.mxu0 %v672_v51 }
 0x602   :  { %v747_v53 = vpop.f32.mrf.mxu0 }
 0x603   :  { %v748_v54 = vadd.f32 %v1242_v52, %v747_v53 }
 0x605   :  { %v752_v55 = vadd.f32 %v748_v54, %v572_v17 }
 0x607   :  { %754 = vadd.xlane.f32.xlu2 %v752_v55  ;;  %v760_v59 = vmul.f32 %v752_v55, %v752_v55 }
 0x60a   :  { %v749_v56 = vpop.f32.mrf.mxu0 }
 0x60b   :  { %v750_v57 = vadd.f32 %v1242_v52, %v749_v56 }
 0x60d   :  { %v1386_v58 = vadd.f32 %v750_v57, %v573_v18 }
 0x60f   :  { %756 = vadd.xlane.f32.xlu1 %v1386_v58  ;;  %762 = vadd.xlane.f32.xlu2 %v760_v59  ;;  %v761_v60 = vmul.f32 %v1386_v58, %v1386_v58 }
 0x617   :  { %764 = vadd.xlane.f32.xlu1 %v761_v60 }
 0x67a   :  { %v755_v1 = vpop.xlane.xlu2 %754 }
 0x67b   :  { %v758_v3 = vmul.f32 0.03125, %v755_v1 }
 0x67d   :  { %v768_v7 = vmul.f32 %v758_v3, %v758_v3  ;;  %v774_v32 = vsub.f32 %v752_v55, %v758_v3 }
 0x682   :  { %v757_v5 = vpop.xlane.xlu1 %756  ;;  %v763_v6 = vpop.xlane.xlu2 %762 }
 0x683   :  { %v766_v8 = vmul.f32 0.03125, %v763_v6  ;;  %v759_v11 = vmul.f32 0.03125, %v757_v5 }
 0x685   :  { %v770_v9 = vsub.f32 %v766_v8, %v768_v7  ;;  %v769_v16 = vmul.f32 %v759_v11, %v759_v11  ;;  %v775_v37 = vsub.f32 %v1386_v58, %v759_v11 }
 0x687   :  { %v772_v12 = vmax.f32 %v770_v9, 0.0 }
 0x689   :  { %v776_v14 = vadd.f32 1e-12, %v772_v12 }
 0x68a   :  { %v765_v15 = vpop.xlane.xlu1 %764 }
 0x68b   :  { %1262 = vrsqrt.f32 %v776_v14  ;;  %v767_v17 = vmul.f32 0.03125, %v765_v15  ;;  %vm784_vm1 = vweird.f32 %v776_v14 }
 0x68d   :  { %v771_v18 = vsub.f32 %v767_v17, %v769_v16 }
 0x68f   :  { %v773_v19 = vmax.f32 %v771_v18, 0.0 }
 0x691   :  { %v1263_v20 = vpop.eup %1262  ;;  %v777_v21 = vadd.f32 1e-12, %v773_v19 }
 0x692   :  { %v779_v22 = vmul.f32 %v1263_v20, %v776_v14  ;;  %vm785_vm0 = vweird.f32 %v1263_v20 }
 0x693   :  { %1264 = vrsqrt.f32 %v777_v21  ;;  %vm786_vm2 = vmor %vm784_vm1, %vm785_vm0  ;;  %vm794_vm4 = vweird.f32 %v777_v21 }
 0x694   :  { %v780_v23 = vmul.f32 %v1263_v20, %v779_v22 }
 0x696   :  { %v781_v24 = vmul.f32 0.5, %v780_v23 }
 0x698   :  { %v782_v25 = vsub.f32 1.5, %v781_v24 }
 0x699   :  { %v1265_v26 = vpop.eup %1264 }
 0x69a   :  { %v783_v27 = vmul.f32 %v1263_v20, %v782_v25  ;;  %v789_v28 = vmul.f32 %v1265_v26, %v777_v21  ;;  %vm795_vm3 = vweird.f32 %v1265_v26 }
 0x69b   :  { %vm796_vm5 = vmor %vm794_vm4, %vm795_vm3 }
 0x69c   :  { %v790_v29 = vmul.f32 %v1265_v26, %v789_v28  ;;  %v787_v30 = vsel %vm786_vm2, %v1263_v20, %v783_v27 }
 0x69d   :  { %v798_v34 = vmul.f32 %v787_v30, %v774_v32 }
 0x69e   :  { %v791_v31 = vmul.f32 0.5, %v790_v29 }
 0x69f   :  { %v801_v40 = vmul.f32 %v1243_v35, %v798_v34 }
 0x6a0   :  { %v792_v33 = vsub.f32 1.5, %v791_v31 }
 0x6a1   :  { %v804_v43 = vadd.f32 %v1244_v41, %v801_v40 }
 0x6a2   :  { %v793_v36 = vmul.f32 %v1265_v26, %v792_v33 }
 0x6a4   :  { %v797_v38 = vsel %vm796_vm5, %v1265_v26, %v793_v36 }
 0x6a5   :  { %v799_v39 = vmul.f32 %v797_v38, %v775_v37 }
 0x6a7   :  { %v802_v42 = vmul.f32 %v1243_v35, %v799_v39 }
 0x6a9   :  { %v805_v44 = vadd.f32 %v1244_v41, %v802_v42 }
 0x6ab   :  { %v806_v45 = vpack.c.bf16 %v805_v44, %v804_v43 }
 0x6ad   :  { %880 = vmatmul.bf16.vlgmr.msra.gmra.mxu1 %v806_v45 }
 0x72a   :  { %v881_v47 = vpop.f32.mrf.mxu1 }
 0x72b   :  { %v882_v48 = vadd.f32 %v1245_v46, %v881_v47 }
 0x72d   :  { %886 = vst [vmem:[#allocation5] sm:$0xff] %v882_v48 }
 0x732   :  { %v883_v49 = vpop.f32.mrf.mxu1 }
 0x733   :  { %v884_v50 = vadd.f32 %v1245_v46, %v883_v49 }
 0x735   :  { %887 = vst [vmem:[#allocation5 + $0x8] sm:$0xff] %v884_v50 }
 0x736   :  { %900 = dma.vmem_to_hbm [thread:$0]  %s893_s9, 256, %s895_s12, [#allocation4], %s1324_s13, %s1324_s13, %s1325_s14  }
 0x737   :  { %1316 = dma.done.wait [#allocation4], 256  }
 0x738   :  { %1317 = vsyncadd [#allocation4], 4294967040 }
 0x739   :  { %905 = vsyncpa [#allocation3], 1 }
 0x73a   :  { %906 = vsyncpa [#allocation4], 1 }

</bundles_post_ra>
